<compile_context>
chip_gen: v6e
topology: v6e:2x2x1
jax: 0.10.0
libtpu: 0.0.40
codegen_flags: <defaults>
</compile_context>

<pallas_src>
import functools
import math

import jax
import jax.numpy as jnp
from jax import lax
from jax.experimental import pallas as pl
from jax.experimental.pallas import tpu as pltpu


def _layernorm_kernel(x_ref, w_ref, b_ref, o_ref, *, eps, hidden,
                      single_pass_stats, cast_to_input_dtype):
    # torch semantics:
    #   x32 = x.float()
    #   u   = x32.mean(-1, keepdim=True)
    #   s   = (x32 - u).pow(2).mean(-1, keepdim=True)   (biased variance)
    #   xn  = (x32 - u) / sqrt(s + eps)
    #   out = weight * xn.to(x.dtype) + bias
    x = x_ref[...].astype(jnp.float32)
    if single_pass_stats:
        # One pass over the tile: two back-to-back cross-lane reductions with
        # no full-tile VALU op between them (shorter XLU dependency chain).
        inv_h = jnp.float32(1.0 / hidden)
        s1 = jnp.sum(x, axis=-1, keepdims=True)
        s2 = jnp.sum(x * x, axis=-1, keepdims=True)
        u = s1 * inv_h
        var = jnp.maximum(s2 * inv_h - u * u, 0.0)   # clamp for robustness
        xc = x - u
    else:
        # Two-pass (bit-for-bit closer to the torch reference).
        u = jnp.mean(x, axis=-1, keepdims=True)
        xc = x - u
        var = jnp.mean(xc * xc, axis=-1, keepdims=True)
    # rsqrt on the (rows, 1) statistics + broadcast multiply keeps the bulk
    # work on the VPU instead of a full-tile divide.
    inv = lax.rsqrt(var + eps)
    xn = xc * inv
    if cast_to_input_dtype:
        # torch: x.to(pdtype) before the affine transform.
        xn = xn.astype(x_ref.dtype)
    out = w_ref[...] * xn + b_ref[...]
    o_ref[...] = out.astype(o_ref.dtype)


def _sublane_multiple(dtype) -> int:
    # Sub-32-bit dtypes pack along sublanes: bf16 -> 16, int8/fp8 -> 32.
    itemsize = jnp.dtype(dtype).itemsize
    return {4: 8, 2: 16, 1: 32}.get(itemsize, 8)


def _vmem_capacity_bytes() -> int:
    try:
        return int(pltpu.get_tpu_info().vmem_capacity_bytes)
    except Exception:
        return 128 << 20  # conservative default (v5e/v6e class)


def _generation_budgets():
    """(per-step combined block budget, vmem_limit ceiling) by VMEM capacity."""
    cap = _vmem_capacity_bytes()
    if cap >= (96 << 20):        # v5e / v6e: 128 MiB physical VMEM
        return (16 << 20), (64 << 20), cap
    else:                        # v7x class: 64 MiB physical VMEM per TC
        return (8 << 20), (48 << 20), cap


def _pick_row_tile(rows, hidden, in_dtype, out_dtype, budget_bytes):
    """Largest sublane-aligned row tile s.t. one (in+out) block pair fits the
    per-step budget AND the grid keeps >= ~8 steps for pipeline steady state
    (and >= 2 steps so v7x's two TensorCores both get work)."""
    # Align to the packing of BOTH dtypes so output stores stay unmasked.
    sub = max(_sublane_multiple(in_dtype), _sublane_multiple(out_dtype))
    bytes_per_row = hidden * (jnp.dtype(in_dtype).itemsize +
                              jnp.dtype(out_dtype).itemsize)
    tile = max(sub, budget_bytes // max(bytes_per_row, 1))
    tile = max(sub, (tile // sub) * sub)
    tile = min(tile, 2048)

    # Enforce a minimum number of grid steps (~8) when rows permit, so the
    # pipeline has a steady state and the parallel axis shards across cores.
    min_steps = 8
    per_step = -(-rows // min_steps)           # cdiv(rows, min_steps)
    per_step = -(-per_step // sub) * sub       # round up to sublane multiple
    tile = min(tile, max(per_step, sub))

    rows_up = -(-rows // sub) * sub
    return max(sub, min(tile, rows_up))


def bert_layer_norm(x, weight, bias, eps=1e-12, *, row_tile=None,
                    out_dtype=None, single_pass_stats=True,
                    cast_to_input_dtype=True, buffer_count=None):
    """LayerNorm over the last axis (TF-style, eps inside the sqrt).

    x: (..., hidden). weight/bias: (hidden,). Returns x.shape.

    out_dtype: default None matches torch promotion (f32 params -> f32 out).
      For bf16 activations in mem-bound pipelines, pass out_dtype=x.dtype to
      cut HBM write traffic ~1.5x (minor deviation from torch's output dtype).
    single_pass_stats: fused sum/sum-of-squares statistics (var clamped >= 0).
      Set False for the two-pass torch-parity path.
    cast_to_input_dtype: keep torch's xn.to(x.dtype) before the affine step.
    buffer_count: optional pipeline depth (>2 uses pl.Buffered); sweep with a
      trace if DMA turnaround is exposed — default double buffering otherwise.

    Perf note: hidden should be a multiple of 128 (lane-dense stores); real
    BERT hiddens (768/1024/...) already are.
    """
    orig_shape = x.shape
    hidden = orig_shape[-1]
    rows = math.prod(orig_shape[:-1]) if len(orig_shape) > 1 else 1
    x2 = x.reshape(rows, hidden)

    w2 = weight.reshape(1, hidden)
    b2 = bias.reshape(1, hidden)

    if out_dtype is None:
        # torch: weight(f32) * xn(x.dtype) + bias(f32) -> promoted dtype.
        out_dtype = jnp.promote_types(x.dtype, weight.dtype)

    budget_bytes, vmem_ceiling, vmem_cap = _generation_budgets()
    if row_tile is None:
        row_tile = _pick_row_tile(rows, hidden, x.dtype, out_dtype,
                                  budget_bytes)

    num_blocks = pl.cdiv(rows, row_tile)

    # VMEM budget: buffered input + output blocks plus (tiny) param blocks,
    # with headroom.  Floored at actual need (manual row_tile / wide hidden),
    # capped at the per-generation ceiling and below physical VMEM.
    n_buf = buffer_count if buffer_count is not None else 2
    block_bytes = row_tile * hidden * (
        jnp.dtype(x.dtype).itemsize + jnp.dtype(out_dtype).itemsize)
    param_bytes = hidden * (jnp.dtype(weight.dtype).itemsize +
                            jnp.dtype(bias.dtype).itemsize)
    vmem_needed = n_buf * block_bytes + 2 * param_bytes
    vmem_limit_bytes = int(min(max(vmem_needed * 1.25, 32 << 20), vmem_ceiling))
    vmem_limit_bytes = max(vmem_limit_bytes, int(vmem_needed * 1.1))
    vmem_limit_bytes = int(min(vmem_limit_bytes, vmem_cap * 0.9))

    if buffer_count is not None and buffer_count != 2:
        big_mode = pl.Buffered(buffer_count)
        x_spec = pl.BlockSpec((row_tile, hidden), lambda i: (i, 0),
                              pipeline_mode=big_mode)
        o_spec = pl.BlockSpec((row_tile, hidden), lambda i: (i, 0),
                              pipeline_mode=big_mode)
    else:
        x_spec = pl.BlockSpec((row_tile, hidden), lambda i: (i, 0))
        o_spec = pl.BlockSpec((row_tile, hidden), lambda i: (i, 0))

    kernel = functools.partial(
        _layernorm_kernel, eps=eps, hidden=hidden,
        single_pass_stats=single_pass_stats,
        cast_to_input_dtype=cast_to_input_dtype)

    out = pl.pallas_call(
        kernel,
        out_shape=jax.ShapeDtypeStruct((rows, hidden), out_dtype),
        grid_spec=pltpu.PrefetchScalarGridSpec(
            num_scalar_prefetch=0,
            grid=(num_blocks,),
            in_specs=[
                x_spec,
                pl.BlockSpec((1, hidden), lambda i: (0, 0)),
                pl.BlockSpec((1, hidden), lambda i: (0, 0)),
            ],
            out_specs=o_spec,
        ),
        compiler_params=pltpu.CompilerParams(
            dimension_semantics=("parallel",),
            vmem_limit_bytes=vmem_limit_bytes),
    )(x2, w2, b2)

    return out.reshape(orig_shape[:-1] + (hidden,))


if __name__ == "__main__":
    # Small shapes consistent with the module: (batch=2, seq=8, hidden=32).
    # NOTE: toy shape for correctness only — do not use it for perf tuning
    # (hidden=32 is not lane-dense; real BERT hiddens are multiples of 128).
    batch, seq, hidden = 2, 8, 32
    key = jax.random.PRNGKey(0)
    x = jax.random.normal(key, (batch, seq, hidden), dtype=jnp.float32)

    # Deterministic parameter init mirroring the module's __init__:
    weight = jnp.ones((hidden,), dtype=jnp.float32)
    bias = jnp.zeros((hidden,), dtype=jnp.float32)

    out = bert_layer_norm(x, weight, bias, eps=1e-12)
    out = jax.block_until_ready(out)

    # Reference check in plain JAX (same math as the torch module, two-pass).
    x32 = x.astype(jnp.float32)
    u = jnp.mean(x32, axis=-1, keepdims=True)
    s = jnp.mean((x32 - u) ** 2, axis=-1, keepdims=True)
    ref = weight * ((x32 - u) / jnp.sqrt(s + 1e-12)).astype(x.dtype) + bias
    assert out.shape == x.shape
    assert jnp.allclose(out, ref, atol=1e-5, rtol=1e-5)

    # Also exercise the torch-parity two-pass path once.
    out2 = bert_layer_norm(x, weight, bias, eps=1e-12,
                           single_pass_stats=False)
    out2 = jax.block_until_ready(out2)
    assert jnp.allclose(out2, ref, atol=1e-5, rtol=1e-5)

    print("KERNEL_OK")
</pallas_src>

<mosaic_0001>
module attributes {stable_mosaic.version = 11 : i64} {
  func.func @_layernorm_kernel(%arg0: i32, %arg1: memref<8x32xf32, #tpu.memory_space<vmem>>, %arg2: memref<1x32xf32, #tpu.memory_space<vmem>>, %arg3: memref<1x32xf32, #tpu.memory_space<vmem>>, %arg4: memref<8x32xf32, #tpu.memory_space<vmem>>) attributes {dimension_semantics = [#tpu.dimension_semantics<parallel>], iteration_bounds = array<i64: 2>, scalar_prefetch = 0 : i64, scratch_operands = 0 : i64, tpu.core_type = #tpu.core_type<tc>, window_params = [{transform_indices = @transform_0, window_bounds = array<i64: 8, 32>}, {pipeline_mode = #tpu.pipeline_mode<synchronous>, transform_indices = @transform_1, window_bounds = array<i64: 1, 32>}, {pipeline_mode = #tpu.pipeline_mode<synchronous>, transform_indices = @transform_2, window_bounds = array<i64: 1, 32>}, {transform_indices = @transform_3, window_bounds = array<i64: 8, 32>}]} {
    %c0 = arith.constant 0 : index
    %c0_0 = arith.constant 0 : index
    %0 = vector.load %arg1[%c0, %c0_0] : memref<8x32xf32, #tpu.memory_space<vmem>>, vector<8x32xf32>
    %cst = arith.constant dense<0.000000e+00> : vector<8xf32>
    %1 = vector.multi_reduction <add>, %0, %cst [1] : vector<8x32xf32> to vector<8xf32>
    %2 = vector.shape_cast %1 : vector<8xf32> to vector<8x1xf32>
    %3 = arith.mulf %0, %0 : vector<8x32xf32>
    %cst_1 = arith.constant dense<0.000000e+00> : vector<8xf32>
    %4 = vector.multi_reduction <add>, %3, %cst_1 [1] : vector<8x32xf32> to vector<8xf32>
    %5 = vector.shape_cast %4 : vector<8xf32> to vector<8x1xf32>
    %cst_2 = arith.constant 3.125000e-02 : f32
    %6 = vector.broadcast %cst_2 : f32 to vector<8x1xf32>
    %7 = arith.mulf %2, %6 : vector<8x1xf32>
    %cst_3 = arith.constant 3.125000e-02 : f32
    %8 = vector.broadcast %cst_3 : f32 to vector<8x1xf32>
    %9 = arith.mulf %5, %8 : vector<8x1xf32>
    %10 = arith.mulf %7, %7 : vector<8x1xf32>
    %11 = arith.subf %9, %10 : vector<8x1xf32>
    %cst_4 = arith.constant 0.000000e+00 : f32
    %12 = vector.broadcast %cst_4 : f32 to vector<8x1xf32>
    %13 = arith.maximumf %11, %12 : vector<8x1xf32>
    %14 = vector.broadcast %7 : vector<8x1xf32> to vector<8x32xf32>
    %15 = arith.subf %0, %14 : vector<8x32xf32>
    %cst_5 = arith.constant 9.99999996E-13 : f32
    %16 = vector.broadcast %cst_5 : f32 to vector<8x1xf32>
    %17 = arith.addf %13, %16 : vector<8x1xf32>
    %18 = math.rsqrt %17 : vector<8x1xf32>
    %19 = vector.broadcast %18 : vector<8x1xf32> to vector<8x32xf32>
    %20 = arith.mulf %15, %19 : vector<8x32xf32>
    %c0_6 = arith.constant 0 : index
    %c0_7 = arith.constant 0 : index
    %21 = vector.load %arg2[%c0_6, %c0_7] : memref<1x32xf32, #tpu.memory_space<vmem>>, vector<1x32xf32>
    %22 = vector.broadcast %21 : vector<1x32xf32> to vector<8x32xf32>
    %23 = arith.mulf %22, %20 : vector<8x32xf32>
    %c0_8 = arith.constant 0 : index
    %c0_9 = arith.constant 0 : index
    %24 = vector.load %arg3[%c0_8, %c0_9] : memref<1x32xf32, #tpu.memory_space<vmem>>, vector<1x32xf32>
    %25 = vector.broadcast %24 : vector<1x32xf32> to vector<8x32xf32>
    %26 = arith.addf %23, %25 : vector<8x32xf32>
    %c0_10 = arith.constant 0 : index
    %c0_11 = arith.constant 0 : index
    %27 = vector.load %arg4[%c0_10, %c0_11] : memref<8x32xf32, #tpu.memory_space<vmem>>, vector<8x32xf32>
    tpu.vector_store %arg4[%c0_10, %c0_11], %26 {strides = array<i32>} : memref<8x32xf32, #tpu.memory_space<vmem>>, vector<8x32xf32>,
    return
  }
  func.func @transform_0(%arg0: i32) -> (i32, i32) {
    %c0_i32 = arith.constant 0 : i32
    %c0_i32_0 = arith.constant 0 : i32
    return %arg0, %c0_i32 : i32, i32
  }
  func.func @transform_1(%arg0: i32) -> (i32, i32) {
    %c0_i32 = arith.constant 0 : i32
    %c0_i32_0 = arith.constant 0 : i32
    %c0_i32_1 = arith.constant 0 : i32
    return %c0_i32, %c0_i32_0 : i32, i32
  }
  func.func @transform_2(%arg0: i32) -> (i32, i32) {
    %c0_i32 = arith.constant 0 : i32
    %c0_i32_0 = arith.constant 0 : i32
    %c0_i32_1 = arith.constant 0 : i32
    return %c0_i32, %c0_i32_0 : i32, i32
  }
  func.func @transform_3(%arg0: i32) -> (i32, i32) {
    %c0_i32 = arith.constant 0 : i32
    %c0_i32_0 = arith.constant 0 : i32
    return %arg0, %c0_i32 : i32, i32
  }
}

</mosaic_0001>

<bundles_post_ra>
// kernel: tpu_custom_call.1
= control target key start
LH: loop header
LB: loop body
LE: loop exit
PB: predicated region body
PF: predicated region fallthrough
CT: control target
= control target key end

     0   :  { %8 = vsyncpa [#allocation3], 0  ;;  %s633_s0 = inlined_call_operand.hbm [shape: f32[16,32], index: 0, kind: input, shape index: {}]   ;;  %s634_s1 = inlined_call_operand.vmem [shape: f32[1,32], index: 1, kind: input, shape index: {}]   ;;  %s635_s2 = inlined_call_operand.vmem [shape: f32[1,32], index: 2, kind: input, shape index: {}]   ;;  %s636_s3 = inlined_call_operand.hbm [shape: f32[16,32], index: 3, kind: output, shape index: {}]  }
   0x1   :  { %10 = vsyncpa [#allocation3 + $0x1], 0 }
   0x2   :  { %11 = vsyncpa [#allocation4], 0 }
   0x3   :  { %13 = vsyncpa [#allocation4 + $0x1], 0  ;;  %s483_s12 = smov 0   ;;  %s485_s13 = smov 0  }
   0x4   :  { %s487_s14 = smov 0   ;;  %s489_s15 = smov 0  }
   0x5 LB: > { %s504_s16 = sadd.s32 4294967295, %s459_s15   ;;  %s305_s17 = sadd.s32 4294967294, %s459_s15   ;;  %s459_s15 = sphi %s489_s15, %s653_s15   ;;  %s455_s14 = sphi %s487_s14, %s652_s14   ;;  %s451_s13 = sphi %s485_s13, %s651_s13   ;;  %s447_s12 = sphi %s483_s12, %s650_s12  }
   0x6   : > { %s508_s18 = sadd.s32 1, %s459_s15   ;;  %s26_s19 = sadd.s32 1, %s455_s14 }
   0x7   : > { %s23_s20 = ssub.s32 %s459_s15, %s508_s18  ;;  %p33_p0 = scmp.ne.s32.totalorder %s455_s14, %s451_s13 }
   0x8   : > { %p24_p1 = scmp.eq.s32.totalorder %s23_s20, 0  ;;  %p34_p2 = scmp.eq.s32.totalorder %s459_s15, 0 }
   0x9   : > { %p39_p3 = scmp.ne.s32.totalorder %s451_s13, %s447_s12  ;;  %p40_p4 = scmp.eq.s32.totalorder %s504_s16, 0 }
   0xa   : > { %s520_s21 = scalar_select %p24_p1, %s455_s14, %s26_s19  }
   0xb   : > { %p522_p5 = por %p34_p2, %p33_p0  ;;  %p526_p6 = por %p40_p4, %p39_p3 }
   0xc   : > { %p105_p7 = scmp.eq.s32.totalorder %s504_s16, 1  ;;  %p111_p8 = scmp.eq.s32.totalorder %s305_s17, 1 }
   0xd   : > { %s640_s23 = scalar_select %p526_p6, 1, 0 }
   0xe   : > { %p331_p10 = scmp.lt.s32.totalorder %s459_s15, 2  ;;  %p533_p11 = por %p105_p7, %p33_p0 }
   0xf   : > { %p537_p12 = por %p111_p8, %p39_p3  ;;  %s137_s26 = sand.u32 1, %s455_s14  }
  0x10   : > { %s641_s24 = scalar_select %p533_p11, 1, 0 }
  0x11   : > { %s642_s25 = scalar_select %p537_p12, 1, 0 }
  0x12   : > { %s309_s27 = sshll.u32 %s459_s15, 7  ;;  %s308_s28 = sshll.u32 %s137_s26, 3 }
  0x13   : > { %s546_s4 = scalar_lea.hbm %s633_s0, %s309_s27  ;;  %s141_s5 = scalar_lea.vmem [#allocation2], %s308_s28 }
  0x14   : > { %s148_s6 = sshll.u32 %s141_s5, 4  ;;  %p550_p13 = pnand %p331_p10, %p522_p5  ;;  %s554_s6 = int_to_ptr.vmem [resolvable:$true] %s148_s6 }
  0x15   : > { %s138_s8 = scalar_lea.sflag [#allocation3], %s137_s26  ;;  %s367_s9 = scalar_lea.hbm %s546_s4, 128 }
  0x16   : > { %p368_p2 = scmp.ne.s32.totalorder %s546_s4, %s367_s9  ;;  %p369_p3 = pneg %p550_p13 }
  0x17   : > { %s372_s17 = scalar_lea.hbm %s633_s0, 256  ;;  %p373_p5 = scmp.lt.s32.totalorder %s546_s4, %s633_s0 }
  0x18   : > { %p370_p4 = pnand %p369_p3, %p368_p2  ;;  %p374_p8 = scmp.lt.s32.totalorder %s372_s17, %s367_s9 }
  0x1a   : > { %p371_p7 = pneg %p370_p4  ;;  %p375_p10 = por %p374_p8, %p373_p5 }
  0x1c   : > { %p376_p9 = pnand %p375_p10, %p371_p7 }
  0x1e   : > { %379 = shalt.err (!%p376_p9)
}
  0x1f   : > { %s380_s22 = scalar_lea.vmem %s554_s6, 128  ;;  %s461_s26 = smov [#allocation2]  }
  0x20   : > { %p381_p0 = scmp.ne.s32.totalorder %s554_s6, %s380_s22  ;;  %s385_s27 = sshll.u32 %s461_s26, 4  ;;  %s386_s27 = int_to_ptr.vmem [resolvable:$false] %s385_s27 }
  0x21   : > { %s387_s28 = scalar_lea.vmem %s386_s27, 256  ;;  %p388_p4 = scmp.lt.s32.totalorder %s554_s6, %s386_s27 }
  0x22   : > { %p383_p1 = pnand %p381_p0, %p369_p3  ;;  %p389_p12 = scmp.lt.s32.totalorder %s387_s28, %s380_s22 }
  0x24   : > { %p384_p2 = pneg %p383_p1  ;;  %p390_p11 = por %p389_p12, %p388_p4 }
  0x26   : > { %p391_p6 = pnand %p390_p11, %p384_p2 }
  0x28   : > { %394 = shalt.err (!%p391_p6)
}
  0x29   : > { %326 = dma.hbm_to_vmem [thread:$0]  (!%p550_p13), %s546_s4, 128, %s554_s6, %s138_s8  }
  0x2a   : > { %p644_p9 = scmp.lt.s32.totalorder %s459_s15, 3  ;;  %p645_p7 = scmp.ge.s32.totalorder %s459_s15, 1 }
  0x2c   : > { %p154_p0 = pnand %p645_p7, %p644_p9 }
  0x2d   : > { %s581_s29 = sand.u32 (!%p154_p0), 1, %s451_s13   ;;  %p646_p6 = scmp.ne.s32.totalorder (!%p154_p0), %s640_s23, 0 }
  0x2e   : > { %157 = sbr.rel (%p154_p0) target bundleno = 237 (0xed), region = 32  ;;  %s311_s30 = sshll.u32 (!%p154_p0), %s581_s29, 3 }
  0x2f   : > { %s160_s5 = scalar_lea.sflag (!%p154_p0), [#allocation3], %s581_s29  ;;  %s163_s9 = scalar_lea.vmem (!%p154_p0), [#allocation2], %s311_s30 }
  0x33   : > { %438 = dma.done.wait (%p646_p6), %s160_s5, 128  }
  0x34   : > { %440 = vsyncadd (%p646_p6), %s160_s5, 4294967168  ;;  %vm187_vm0 = vcmask 261120   ;;  %v186_v0 = vld [vmem:[%s163_s9] sm:$0xff]  ;;  %s316_s8 = sshll.u32 %s504_s16, 7  ;;  %s185_s10 = scalar_lea.vmem [#allocation5], %s311_s30 }
  0x35   : > { %v188_v1 = vsel %vm187_vm0, %v186_v0, 0.0  ;;  %v191_v2 = vmul.f32 %v186_v0, %v186_v0  ;;  %v313_v14 = vld [vmem:[%s634_s1] ss:$0 sm:$0xff]  ;;  %s235_s11 = sshll.u32 %s185_s10, 4  ;;  %s233_s20 = scalar_lea.hbm %s636_s3, %s316_s8  ;;  %s236_s11 = int_to_ptr.vmem [resolvable:$true] %s235_s11 }
  0x36   : > { %189 = vadd.xlane.f32.xlu0 %v188_v1  ;;  %v314_v16 = vld [vmem:[%s635_s2] ss:$0 sm:$0xff]  ;;  %s222_s22 = scalar_lea.sflag [#allocation4], %s581_s29  ;;  %s395_s26 = scalar_lea.vmem %s236_s11, 128 }
  0x37   : > { %v192_v3 = vsel %vm187_vm0, %v191_v2, 0.0  ;;  %p396_p11 = scmp.ne.s32.totalorder %s236_s11, %s395_s26  ;;  %p647_p12 = scmp.ne.s32.totalorder %s641_s24, 0 }
  0x38   : > { %s462_s27 = smov [#allocation5]  }
  0x39   : > { %p397_p13 = pnand %p396_p11, %p647_p12  ;;  %s399_s28 = sshll.u32 %s462_s27, 4  ;;  %s400_s28 = int_to_ptr.vmem [resolvable:$false] %s399_s28 }
  0x3a   : > { %193 = vadd.xlane.f32.xlu0 %v192_v3  ;;  %s401_s16 = scalar_lea.vmem %s400_s28, 256  ;;  %p402_p3 = scmp.lt.s32.totalorder %s236_s11, %s400_s28 }
  0x3b   : > { %p398_p1 = pneg %p397_p13  ;;  %p403_p5 = scmp.lt.s32.totalorder %s401_s16, %s395_s26 }
  0x3d   : > { %p404_p8 = por %p403_p5, %p402_p3 }
  0x3f   : > { %p405_p10 = pnand %p404_p8, %p398_p1 }
  0xbf   : > { %v190_v4 = vpop.xlane.xlu0 %189 }
  0xc0   : > { %v195_v5 = vmul.f32 0.03125, %v190_v4 }
  0xc2   : > { %v197_v7 = vmul.f32 %v195_v5, %v195_v5  ;;  %v200_v12 = vsub.f32 %v186_v0, %v195_v5 }
  0xc3   : > { %v194_v6 = vpop.xlane.xlu0 %193 }
  0xc4   : > { %v196_v8 = vmul.f32 0.03125, %v194_v6 }
  0xc6   : > { %v198_v9 = vsub.f32 %v196_v8, %v197_v7 }
  0xc8   : > { %v199_v10 = vmax.f32 %v198_v9, 0.0 }
  0xca   : > { %v201_v11 = vadd.f32 1e-12, %v199_v10 }
  0xcc   : > { %365 = vrsqrt.f32 %v201_v11 }
  0xd9   : > { %v366_v13 = vpop.eup %365 }
  0xda   : > { %v203_v15 = vmul.f32 %v366_v13, %v200_v12 }
  0xdc   : > { %v211_v17 = vmul.f32 %v313_v14, %v203_v15 }
  0xde   : > { %v219_v18 = vadd.f32 %v314_v16, %v211_v17 }
  0xe0   : > { %220 = vst.msk [vmem:[%s185_s10] sm:$0xff] %vm187_vm0, %v219_v18 }
  0xe1   : > { %408 = shalt.err (!%p405_p10)
}
  0xe2   : > { %s409_s30 = scalar_lea.hbm %s233_s20, 128  ;;  %s413_s9 = scalar_lea.hbm %s636_s3, 256 }
  0xe3   : > { %p410_p2 = scmp.ne.s32.totalorder %s233_s20, %s409_s30  ;;  %p414_p7 = scmp.lt.s32.totalorder %s233_s20, %s636_s3 }
  0xe4   : > { %p415_p0 = scmp.lt.s32.totalorder %s413_s9, %s409_s30 }
  0xe5   : > { %p411_p4 = pnand %p410_p2, %p647_p12 }
  0xe6   : > { %p416_p6 = por %p415_p0, %p414_p7 }
  0xe7   : > { %p412_p9 = pneg %p411_p4 }
  0xe9   : > { %p417_p11 = pnand %p416_p6, %p412_p9 }
  0xeb   : > { %420 = shalt.err (!%p417_p11)
}
  0xec   : > { %321 = dma.vmem_to_hbm [thread:$0]  (%p647_p12), %s236_s11, 128, %s233_s20, %s222_s22  }
  0xed PF: > { %s247_s6 = sand.u32 1, %s447_s12   ;;  %p648_p13 = scmp.ne.s32.totalorder %s642_s25, 0 }
  0xee   : > { %p649_p1 = scmp.ge.s32.totalorder %s459_s15, 2  ;;  %s248_s7 = scalar_lea.sflag [#allocation4], %s247_s6 }
  0xf0   : > { %p328_p3 = pnand %p649_p1, %p648_p13 }
  0xf2   : > { %p329_p5 = pneg %p328_p3 }
  0xf4   : > { %442 = dma.done.wait (%p329_p5), %s248_s7, 128  }
  0xf5   : > { %444 = vsyncadd (%p329_p5), %s248_s7, 4294967168  ;;  %p16_p8 = scmp.ge.s32.totalorder %s508_s18, 4   ;;  %s650_s12 = smov %s451_s13 }
  0xf6   : > { %s651_s13 = smov %s455_s14  ;;  %s652_s14 = smov %s520_s21 }
  0xf7   : > { %s653_s15 = smov %s508_s18  ;;  %18 = sbr.rel (!%p16_p8) target bundleno = 5 (0x5), region = 77 }
  0xfc   :  { %253 = vsyncpa [#allocation3], 1 }
  0xfd   :  { %255 = vsyncpa [#allocation3 + $0x1], 1 }
  0xfe   :  { %256 = vsyncpa [#allocation4], 1 }
  0xff   :  { %258 = vsyncpa [#allocation4 + $0x1], 1 }

</bundles_post_ra>
